<compile_context>
chip_gen: v5e
topology: v5e:2x2
jax: 0.10.0
libtpu: 0.0.40
codegen_flags: <defaults>
</compile_context>

<pallas_src>
import functools

import jax
import jax.numpy as jnp
from jax.experimental import pallas as pl
from jax.experimental.pallas import tpu as pltpu


# --------------------------------------------------------------------------
# helpers
# --------------------------------------------------------------------------
def _round_up(v, m):
    return ((v + m - 1) // m) * m


def _vmem_budget_bytes():
    """Generation-aware scoped-VMEM budget (bytes)."""
    try:
        phys = int(pltpu.get_tpu_info().vmem_capacity_bytes)
    except Exception:
        phys = 64 * 1024 * 1024          # conservative: v7x per-core VMEM
    # v5e/v6e (128 MiB physical) -> 96 MiB, v7x (64 MiB) -> 48 MiB.
    return min(int(phys * 3 // 4), 96 * 1024 * 1024)


def _auto_block_rows(n, d, kp, vmem_budget, requested=None):
    """Pick the row-tile size: as big as the VMEM budget allows (<=2048)."""
    # Resident blocks: (D,D) Gram accumulator (stats) and (D,Kp) PC slab
    # (projection); count both double-buffered to stay conservative.
    resident = 2 * d * d * 4 + 2 * d * kp * 4 + (2 << 20)
    per_row = 2 * (d + kp) * 4            # double-buffered x row + out row
    tn = (vmem_budget - resident) // per_row
    tn = min(tn, 2048)
    # keep at least two row blocks so the dual-core stats split has work
    tn = min(tn, _round_up(pl.cdiv(n, 2), 8))
    if requested is not None:
        tn = min(tn, int(requested))
    tn = min(tn, n)
    return max(8, (tn // 8) * 8)


# --------------------------------------------------------------------------
# kernel 1: shifted column sums + Gram, tiled over N, dual-core partials
# --------------------------------------------------------------------------
def _stats_kernel(x_ref, shift_ref, sum_ref, gram_ref, *,
                  n_rows, block_rows, steps_per_core, needs_mask):
    c = pl.program_id(0)          # "core" axis (parallel)
    j = pl.program_id(1)          # reduction axis (arbitrary, innermost)

    @pl.when(j == 0)
    def _init():
        sum_ref[...] = jnp.zeros_like(sum_ref)
        gram_ref[...] = jnp.zeros_like(gram_ref)

    # Shifted data: y = x - x[0]  (stabilizes Gram - n*mu*mu^T cancellation).
    y = x_ref[...] - shift_ref[...]                       # (TN, D) f32

    def _accumulate(yv):
        # Column sums (XLU cross-sublane reduce).
        sum_ref[...] += jnp.sum(yv, axis=0, keepdims=True)
        # Y^T Y via dot_general contracting axis 0 of both operands: no
        # explicit transpose of the (TN, D) tile before the MXU.
        gram_ref[...] += jax.lax.dot_general(
            yv, yv,
            dimension_numbers=(((0,), (0,)), ((), ())),
            preferred_element_type=jnp.float32,
        )

    if not needs_mask:
        _accumulate(y)
    else:
        start = (c * steps_per_core + j) * block_rows
        is_full = start + block_rows <= n_rows

        @pl.when(is_full)
        def _full_tile():
            _accumulate(y)

        @pl.when(jnp.logical_not(is_full))
        def _boundary_tile():
            # Only boundary / fully-OOB tiles pay the iota + select mask.
            row = jax.lax.broadcasted_iota(jnp.int32, y.shape, 0) + start
            _accumulate(jnp.where(row < n_rows, y, 0.0))


def _mean_and_cov_pallas(x, *, block_rows, vmem_limit):
    n, d = x.shape
    nblocks = pl.cdiv(n, block_rows)
    spc = pl.cdiv(nblocks, 2)                       # row blocks per core
    needs_mask = (2 * spc * block_rows != n)
    shift = x[:1, :]                                # (1, D) cheap shift row

    if 2 * spc > nblocks:
        # Odd block count: core 1's last logical block is fully OOB; clamp
        # the block index (it re-reads the last block, kernel masks it out).
        x_map = lambda c, j: (jnp.minimum(c * spc + j, nblocks - 1), 0)
    else:
        x_map = lambda c, j: (c * spc + j, 0)

    kernel = functools.partial(
        _stats_kernel, n_rows=n, block_rows=block_rows,
        steps_per_core=spc, needs_mask=needs_mask)

    sums, grams = pl.pallas_call(
        kernel,
        grid=(2, spc),
        in_specs=[
            pl.BlockSpec((block_rows, d), x_map),
            pl.BlockSpec((1, d), lambda c, j: (0, 0)),
        ],
        out_specs=(
            pl.BlockSpec((None, 1, d), lambda c, j: (c, 0, 0)),
            pl.BlockSpec((None, d, d), lambda c, j: (c, 0, 0)),
        ),
        out_shape=(
            jax.ShapeDtypeStruct((2, 1, d), jnp.float32),
            jax.ShapeDtypeStruct((2, d, d), jnp.float32),
        ),
        compiler_params=pltpu.CompilerParams(
            # Leading axis shards the reduction across TensorCores on v7x;
            # the inner (reduction) axis keeps the partials VMEM-resident.
            dimension_semantics=("parallel", "arbitrary"),
            vmem_limit_bytes=vmem_limit,
        ),
        cost_estimate=pl.CostEstimate(
            flops=2 * n * d * d,
            transcendentals=0,
            bytes_accessed=(n * d + 2 * (d * d + d)) * 4,
        ),
    )(x, shift)

    # Finalize in the wrapper (moved out of the kernel per review).
    nf = jnp.float32(n)
    mu_y = sums.sum(axis=0) / nf                     # (1, D) shifted mean
    gram_y = grams.sum(axis=0)                       # (D, D)
    cov = (gram_y - nf * (mu_y.T @ mu_y)) / (nf - 1.0)
    mean = shift.astype(jnp.float32) + mu_y          # (1, D)
    return mean, cov


# --------------------------------------------------------------------------
# kernel 2a: projection with fused centering, lane-dense padded-K output
# --------------------------------------------------------------------------
def _project_kernel(x_ref, pc_ref, mproj_ref, out_ref):
    # (x - mean) @ PC == (x @ PC) - (mean @ PC); mean @ PC is precomputed.
    out_ref[...] = (
        jnp.dot(x_ref[...], pc_ref[...], preferred_element_type=jnp.float32)
        - mproj_ref[...]
    )


def _project_pallas(x, pc_padded, mean_proj, *, block_rows, vmem_limit):
    n, d = x.shape
    kp = pc_padded.shape[1]
    grid_n = pl.cdiv(n, block_rows)
    return pl.pallas_call(
        _project_kernel,
        grid=(grid_n,),
        in_specs=[
            pl.BlockSpec((block_rows, d), lambda i: (i, 0)),
            pl.BlockSpec((d, kp), lambda i: (0, 0)),
            pl.BlockSpec((1, kp), lambda i: (0, 0)),
        ],
        out_specs=pl.BlockSpec((block_rows, kp), lambda i: (i, 0)),
        out_shape=jax.ShapeDtypeStruct((n, kp), jnp.float32),
        compiler_params=pltpu.CompilerParams(
            dimension_semantics=("parallel",),
            vmem_limit_bytes=vmem_limit,
        ),
        cost_estimate=pl.CostEstimate(
            flops=2 * n * d * kp,
            transcendentals=0,
            bytes_accessed=(n * d + d * kp + kp + n * kp) * 4,
        ),
    )(x, pc_padded, mean_proj)


# --------------------------------------------------------------------------
# kernel 2b: small-K / small-D projection, transposed (Kp8, N) output
# --------------------------------------------------------------------------
def _project_t_kernel(x_ref, pct_ref, mprojt_ref, out_ref):
    # PC^T @ (x - mean)^T == PC^T @ x^T - PC^T @ mean^T ; second term is the
    # precomputed (Kp, 1) column.  Output tile (Kp, TN) is lane-dense in N.
    out_ref[...] = (
        jax.lax.dot_general(
            pct_ref[...], x_ref[...],
            dimension_numbers=(((1,), (1,)), ((), ())),
            preferred_element_type=jnp.float32)
        - mprojt_ref[...]
    )


def _project_t_pallas(x, pc_t, mean_proj_t, *, block_rows, vmem_limit):
    n, d = x.shape
    kp = pc_t.shape[0]
    grid_n = pl.cdiv(n, block_rows)
    return pl.pallas_call(
        _project_t_kernel,
        grid=(grid_n,),
        in_specs=[
            pl.BlockSpec((block_rows, d), lambda i: (i, 0)),
            pl.BlockSpec((kp, d), lambda i: (0, 0)),
            pl.BlockSpec((kp, 1), lambda i: (0, 0)),
        ],
        out_specs=pl.BlockSpec((kp, block_rows), lambda i: (0, i)),
        out_shape=jax.ShapeDtypeStruct((kp, n), jnp.float32),
        compiler_params=pltpu.CompilerParams(
            dimension_semantics=("parallel",),
            vmem_limit_bytes=vmem_limit,
        ),
        cost_estimate=pl.CostEstimate(
            flops=2 * n * d * kp,
            transcendentals=0,
            bytes_accessed=(n * d + d * kp + kp + n * kp) * 4,
        ),
    )(x, pc_t, mean_proj_t)


# --------------------------------------------------------------------------
# forward
# --------------------------------------------------------------------------
def _pca_reference(x, num_components):
    """Pure-JAX reference mirroring the PyTorch module line-by-line."""
    x = x.astype(jnp.float32)
    x_mean = x.mean(0)
    x_centered = x - x_mean
    x_covar = x_centered.T @ x_centered / (x.shape[0] - 1)
    eigenvalues, eigenvectors = jnp.linalg.eigh(x_covar)
    _, topk_indices = jax.lax.top_k(eigenvalues, num_components)
    principal_components = eigenvectors[:, topk_indices]
    return x_centered @ principal_components


def pca_forward(x, num_components, *, block_rows=None,
                min_rows=256, min_feats=128):
    """Exact semantics of PCA.forward(x) for 2-D x of shape (N, D)."""
    x = x.astype(jnp.float32)
    n, d = x.shape
    k = int(num_components)

    vmem_budget = _vmem_budget_bytes()
    small_k = (k <= 32) and (d <= 256)
    kp = _round_up(k, 8) if small_k else max(128, _round_up(k, 128))

    # Tiny problems (Pallas launch overhead dominates) or a (D,D) covariance
    # block that cannot fit the per-core VMEM budget: fall back to plain XLA.
    # TODO(synk): add a (dj, dk)-tiled Gram variant for very large D instead
    # of falling back to the reference.
    cov_resident = 2 * d * d * 4
    if n < min_rows or d < min_feats or cov_resident + (4 << 20) > vmem_budget:
        return _pca_reference(x, k)

    tn = _auto_block_rows(n, d, kp, vmem_budget, requested=block_rows)

    # ---- kernel 1: shifted column sums + Gram (dual-core partials) --------
    mean, cov = _mean_and_cov_pallas(x, block_rows=tn, vmem_limit=vmem_budget)

    # ---- eigendecomposition + top-k (plain JAX glue) -----------------------
    # TODO(synk): torch.linalg.eigh / torch.topk have no Pallas lowering; use
    # jnp.linalg.eigh + lax.top_k between the two kernels.
    eigenvalues, eigenvectors = jnp.linalg.eigh(cov)
    _, topk_indices = jax.lax.top_k(eigenvalues, k)
    principal_components = eigenvectors[:, topk_indices]          # (D, K)

    # ---- kernel 2: projection with fused centering -------------------------
    if small_k:
        # Transposed (Kp8, N) output: N on lanes keeps stores lane-dense
        # without padding K to 128 output lanes (less output HBM traffic).
        pc_t = jnp.zeros((kp, d), jnp.float32).at[:k, :].set(
            principal_components.T)
        mproj_t = pc_t @ mean.T                                    # (Kp8, 1)
        tn_p = n if tn >= n else max(128, (tn // 128) * 128)
        out_t = _project_t_pallas(x, pc_t, mproj_t, block_rows=tn_p,
                                  vmem_limit=vmem_budget)
        return out_t[:k, :].T
    else:
        pc_pad = jnp.zeros((d, kp), jnp.float32).at[:, :k].set(
            principal_components)
        mproj = mean @ pc_pad                                      # (1, Kp)
        out = _project_pallas(x, pc_pad, mproj, block_rows=tn,
                              vmem_limit=vmem_budget)
        return out[:, :k]


if __name__ == "__main__":
    # 512 samples x 128 features, keep top 16 PCs.  block_rows=128 -> stats
    # grid (2, 2): exercises the dual-core partial accumulation and the
    # transposed small-K projection path.
    N, D, K = 512, 128, 16
    key = jax.random.PRNGKey(0)
    kx, km = jax.random.split(key)
    x = jax.random.normal(kx, (N, D), dtype=jnp.float32)
    x = x + 0.5 * jax.random.normal(km, (1, D), dtype=jnp.float32)  # nonzero mean

    out = jax.block_until_ready(pca_forward(x, K, block_rows=128))
    ref = jax.block_until_ready(_pca_reference(x, K))
    assert out.shape == (N, K), out.shape
    # eigh column signs are arbitrary; align per column before comparing.
    sign = jnp.sign(jnp.sum(out * ref, axis=0, keepdims=True))
    sign = jnp.where(sign == 0, 1.0, sign)
    err = float(jnp.max(jnp.abs(out * sign - ref)))
    assert err < 2e-3, err

    # Ragged N: exercises the pl.when-gated boundary mask and the clamped
    # fully-out-of-range grid step (5 row blocks split 3+3 across "cores").
    N2 = 520
    x2 = jax.random.normal(jax.random.PRNGKey(1), (N2, D), dtype=jnp.float32)
    x2 = x2 + 1.0
    out2 = jax.block_until_ready(pca_forward(x2, K, block_rows=128))
    ref2 = jax.block_until_ready(_pca_reference(x2, K))
    assert out2.shape == (N2, K), out2.shape
    sign2 = jnp.sign(jnp.sum(out2 * ref2, axis=0, keepdims=True))
    sign2 = jnp.where(sign2 == 0, 1.0, sign2)
    err2 = float(jnp.max(jnp.abs(out2 * sign2 - ref2)))
    assert err2 < 2e-3, err2

    print("KERNEL_OK")
</pallas_src>

<mosaic_0001>
module attributes {stable_mosaic.version = 11 : i64} {
  func.func @_stats_kernel(%arg0: i32, %arg1: i32, %arg2: memref<128x128xf32, #tpu.memory_space<vmem>>, %arg3: memref<1x128xf32, #tpu.memory_space<vmem>>, %arg4: memref<1x1x128xf32, #tpu.memory_space<vmem>>, %arg5: memref<1x128x128xf32, #tpu.memory_space<vmem>>) attributes {dimension_semantics = [#tpu.dimension_semantics<parallel>, #tpu.dimension_semantics<arbitrary>], iteration_bounds = array<i64: 2, 2>, scalar_prefetch = 0 : i64, scratch_operands = 0 : i64, tpu.core_type = #tpu.core_type<tc>, window_params = [{transform_indices = @transform_0, window_bounds = array<i64: 128, 128>}, {pipeline_mode = #tpu.pipeline_mode<synchronous>, transform_indices = @transform_1, window_bounds = array<i64: 1, 128>}, {transform_indices = @transform_2, window_bounds = array<i64: 1, 1, 128>}, {transform_indices = @transform_3, window_bounds = array<i64: 1, 128, 128>}]} {
    %c0_i32 = arith.constant 0 : i32
    %0 = arith.cmpi eq, %arg1, %c0_i32 : i32
    %1 = arith.extui %0 : i1 to i32
    %c0_i32_0 = arith.constant 0 : i32
    %2 = arith.cmpi ne, %1, %c0_i32_0 : i32
    scf.if %2 {
      %cst_17 = arith.constant 0.000000e+00 : f32
      %22 = vector.broadcast %cst_17 : f32 to vector<1x128xf32>
      %c0_18 = arith.constant 0 : index
      %c0_19 = arith.constant 0 : index
      %c0_20 = arith.constant 0 : index
      %23 = vector.load %arg4[%c0_18, %c0_19, %c0_20] : memref<1x1x128xf32, #tpu.memory_space<vmem>>, vector<1x1x128xf32>
      %24 = vector.shape_cast %23 : vector<1x1x128xf32> to vector<1x128xf32>
      %25 = vector.shape_cast %22 : vector<1x128xf32> to vector<1x1x128xf32>
      tpu.vector_store %arg4[%c0_18, %c0_19, %c0_20], %25 {strides = array<i32>} : memref<1x1x128xf32, #tpu.memory_space<vmem>>, vector<1x1x128xf32>,
      %cst_21 = arith.constant 0.000000e+00 : f32
      %26 = vector.broadcast %cst_21 : f32 to vector<128x128xf32>
      %c0_22 = arith.constant 0 : index
      %c0_23 = arith.constant 0 : index
      %c0_24 = arith.constant 0 : index
      %27 = vector.load %arg5[%c0_22, %c0_23, %c0_24] : memref<1x128x128xf32, #tpu.memory_space<vmem>>, vector<1x128x128xf32>
      %28 = vector.shape_cast %27 : vector<1x128x128xf32> to vector<128x128xf32>
      %29 = vector.shape_cast %26 : vector<128x128xf32> to vector<1x128x128xf32>
      tpu.vector_store %arg5[%c0_22, %c0_23, %c0_24], %29 {strides = array<i32>} : memref<1x128x128xf32, #tpu.memory_space<vmem>>, vector<1x128x128xf32>,
    } else {
    }
    %c0 = arith.constant 0 : index
    %c0_1 = arith.constant 0 : index
    %3 = vector.load %arg2[%c0, %c0_1] : memref<128x128xf32, #tpu.memory_space<vmem>>, vector<128x128xf32>
    %c0_2 = arith.constant 0 : index
    %c0_3 = arith.constant 0 : index
    %4 = vector.load %arg3[%c0_2, %c0_3] : memref<1x128xf32, #tpu.memory_space<vmem>>, vector<1x128xf32>
    %5 = vector.broadcast %4 : vector<1x128xf32> to vector<128x128xf32>
    %6 = arith.subf %3, %5 : vector<128x128xf32>
    %c0_4 = arith.constant 0 : index
    %c0_5 = arith.constant 0 : index
    %c0_6 = arith.constant 0 : index
    %7 = vector.load %arg4[%c0_4, %c0_5, %c0_6] : memref<1x1x128xf32, #tpu.memory_space<vmem>>, vector<1x1x128xf32>
    %8 = vector.shape_cast %7 : vector<1x1x128xf32> to vector<1x128xf32>
    %cst = arith.constant dense<0.000000e+00> : vector<128xf32>
    %9 = vector.multi_reduction <add>, %6, %cst [0] : vector<128x128xf32> to vector<128xf32>
    %10 = vector.shape_cast %9 : vector<128xf32> to vector<1x128xf32>
    %11 = arith.addf %8, %10 : vector<1x128xf32>
    %c0_7 = arith.constant 0 : index
    %c0_8 = arith.constant 0 : index
    %c0_9 = arith.constant 0 : index
    %12 = vector.load %arg4[%c0_7, %c0_8, %c0_9] : memref<1x1x128xf32, #tpu.memory_space<vmem>>, vector<1x1x128xf32>
    %13 = vector.shape_cast %12 : vector<1x1x128xf32> to vector<1x128xf32>
    %14 = vector.shape_cast %11 : vector<1x128xf32> to vector<1x1x128xf32>
    tpu.vector_store %arg4[%c0_7, %c0_8, %c0_9], %14 {strides = array<i32>} : memref<1x1x128xf32, #tpu.memory_space<vmem>>, vector<1x1x128xf32>,
    %c0_10 = arith.constant 0 : index
    %c0_11 = arith.constant 0 : index
    %c0_12 = arith.constant 0 : index
    %15 = vector.load %arg5[%c0_10, %c0_11, %c0_12] : memref<1x128x128xf32, #tpu.memory_space<vmem>>, vector<1x128x128xf32>
    %16 = vector.shape_cast %15 : vector<1x128x128xf32> to vector<128x128xf32>
    %cst_13 = arith.constant dense<0.000000e+00> : vector<128x128xf32>
    %17 = tpu.matmul %6, %6, %cst_13 {dimension_numbers = #tpu.dot_dimension_numbers<[0], [0], [1], [1], [0, 1, 1, 1], [], []>} : vector<128x128xf32>, vector<128x128xf32>, vector<128x128xf32> -> vector<128x128xf32>
    %18 = arith.addf %16, %17 : vector<128x128xf32>
    %c0_14 = arith.constant 0 : index
    %c0_15 = arith.constant 0 : index
    %c0_16 = arith.constant 0 : index
    %19 = vector.load %arg5[%c0_14, %c0_15, %c0_16] : memref<1x128x128xf32, #tpu.memory_space<vmem>>, vector<1x128x128xf32>
    %20 = vector.shape_cast %19 : vector<1x128x128xf32> to vector<128x128xf32>
    %21 = vector.shape_cast %18 : vector<128x128xf32> to vector<1x128x128xf32>
    tpu.vector_store %arg5[%c0_14, %c0_15, %c0_16], %21 {strides = array<i32>} : memref<1x128x128xf32, #tpu.memory_space<vmem>>, vector<1x128x128xf32>,
    return
  }
  func.func @transform_0(%arg0: i32, %arg1: i32) -> (i32, i32) {
    %c2_i32 = arith.constant 2 : i32
    %0 = arith.muli %arg0, %c2_i32 : i32
    %1 = arith.addi %0, %arg1 : i32
    %c0_i32 = arith.constant 0 : i32
    %c0_i32_0 = arith.constant 0 : i32
    return %1, %c0_i32 : i32, i32
  }
  func.func @transform_1(%arg0: i32, %arg1: i32) -> (i32, i32) {
    %c0_i32 = arith.constant 0 : i32
    %c0_i32_0 = arith.constant 0 : i32
    %c0_i32_1 = arith.constant 0 : i32
    return %c0_i32, %c0_i32_0 : i32, i32
  }
  func.func @transform_2(%arg0: i32, %arg1: i32) -> (i32, i32, i32) {
    %c0_i32 = arith.constant 0 : i32
    %c0_i32_0 = arith.constant 0 : i32
    %c0_i32_1 = arith.constant 0 : i32
    return %arg0, %c0_i32, %c0_i32_0 : i32, i32, i32
  }
  func.func @transform_3(%arg0: i32, %arg1: i32) -> (i32, i32, i32) {
    %c0_i32 = arith.constant 0 : i32
    %c0_i32_0 = arith.constant 0 : i32
    %c0_i32_1 = arith.constant 0 : i32
    return %arg0, %c0_i32, %c0_i32_0 : i32, i32, i32
  }
}

</mosaic_0001>

<bundles_post_ra>
// kernel: tpu_custom_call.1
= control target key start
LH: loop header
LB: loop body
LE: loop exit
PB: predicated region body
PF: predicated region fallthrough
CT: control target
= control target key end

     0   :  { %s1482_s0 = inlined_call_operand.hbm [shape: f32[512,128], index: 0, kind: input, shape index: {}]   ;;  %s1483_s1 = inlined_call_operand.hbm [shape: f32[1,128], index: 1, kind: input, shape index: {}]   ;;  %s1484_s2 = inlined_call_operand.hbm [shape: f32[2,1,128], index: 2, kind: output, shape index: {0}]   ;;  %s1485_s3 = inlined_call_operand.hbm [shape: f32[2,128,128], index: 3, kind: output, shape index: {1}]  }
   0x1   :  { %1495 = sst [smem:[#allocation19_spill]] %s1483_s1 }
   0x2   :  { %1496 = sst [smem:[#allocation20_spill]] %s1484_s2 }
   0x3   :  { %1497 = sst [smem:[#allocation21_spill]] %s1485_s3 }
   0x4   :  { %9 = vsyncpa [#allocation3], 0 }
   0x5   :  { %11 = vsyncpa [#allocation3 + $0x1], 0 }
   0x6   :  { %12 = vsyncpa [#allocation6], 0 }
   0x7   :  { %13 = vsyncpa [#allocation4], 0 }
   0x8   :  { %15 = vsyncpa [#allocation4 + $0x1], 0 }
   0x9   :  { %16 = vsyncpa [#allocation9], 0 }
   0xa   :  { %18 = vsyncpa [#allocation9 + $0x1], 0  ;;  %s1061_s12 = smov 0   ;;  %s1063_s13 = smov 0  }
   0xb   :  { %s1065_s14 = smov 0   ;;  %s1067_s15 = smov 0  }
   0xc   :  { %s1069_s16 = smov 0   ;;  %s1071_s17 = smov 0  }
   0xd   :  { %s1073_s18 = smov 0   ;;  %s1075_s19 = smov 0  }
   0xe   :  { %s1077_s20 = smov 0   ;;  %s1079_s21 = smov 0  }
   0xf   :  { %s1081_s22 = smov 0  }
  0x10 LB: > { %1498 = sst [smem:[#allocation14_spill]] %s993_s12  ;;  %s620_s23 = sadd.s32 4294967295, %s1033_s22   ;;  %s1033_s22 = sphi %s1081_s22, %s24_s22   ;;  %s1029_s21 = sphi %s1079_s21, %s1529_s21   ;;  %s1025_s20 = sphi %s1077_s20, %s1528_s20   ;;  %s1021_s19 = sphi %s1075_s19, %s1527_s19   ;;  %s1017_s18 = sphi %s1073_s18, %s1519_s18   ;;  %s1013_s17 = sphi %s1071_s17, %s1526_s17   ;;  %s1009_s16 = sphi %s1069_s16, %s1525_s16   ;;  %s1005_s15 = sphi %s1067_s15, %s1524_s15   ;;  %s1001_s14 = sphi %s1065_s14, %s1523_s14   ;;  %s997_s13 = sphi %s1063_s13, %s1522_s13   ;;  %s993_s12 = sphi %s1061_s12, %s1521_s12  }
  0x11   : > { %1499 = sst [smem:[#allocation15_spill]] %s1025_s20  ;;  %s621_s24 = sadd.s32 4294967294, %s1033_s22  }
  0x12   : > { %1500 = sst [smem:[#allocation16_spill]] %s1033_s22  ;;  %p54_p0 = scmp.ne.s32.totalorder %s1013_s17, %s1009_s16 }
  0x13   : > { %p55_p1 = scmp.eq.s32.totalorder %s1033_s22, 0  ;;  %p60_p2 = scmp.ne.s32.totalorder %s1009_s16, %s1005_s15 }
  0x14   : > { %p1120_p3 = scmp.eq.s32.totalorder %s620_s23, 0  ;;  %p104_p6 = scmp.ne.s32.totalorder %s1001_s14, %s997_s13 }
  0x15   : > { %p1124_p4 = por %p55_p1, %p54_p0  ;;  %p105_p7 = scmp.eq.s32.totalorder %s620_s23, 3 }
  0x16   : > { %p1131_p5 = por %p1120_p3, %p60_p2  ;;  %p110_p8 = scmp.ne.s32.totalorder %s997_s13, %s993_s12 }
  0x17   : > { %p111_p9 = scmp.eq.s32.totalorder %s621_s24, 3  ;;  %p624_p10 = scmp.ge.s32.totalorder %s1033_s22, 1 }
  0x18   : > { %p1140_p11 = por %p105_p7, %p104_p6  ;;  %p144_p12 = scmp.lt.s32.totalorder %s1033_s22, 5 }
  0x19   : > { %p1145_p13 = por %p111_p9, %p110_p8  ;;  %s1509_s1 = sld [smem:[#allocation19_spill]] }
  0x1a   : > { %s1504_s29 = scalar_select %p1140_p11, 1, 0 }
  0x1b   : > { %s1506_s30 = scalar_select %p1145_p13, 1, 0 }
  0x1c   : > { %1505 = sst [smem:[#allocation17_spill]] %s1504_s29  ;;  %p1149_p0 = pnand %p624_p10, %p144_p12 }
  0x1d   : > { %1507 = sst [smem:[#allocation18_spill]] %s1506_s30  ;;  %s1035_s8 = smov [#allocation5]  }
  0x1e   : > { %p701_p1 = pneg %p1149_p0  ;;  %s158_s9 = sshll.u32 %s1035_s8, 4  ;;  %s159_s9 = int_to_ptr.vmem [resolvable:$true] %s158_s9 }
  0x1f   : > { %s156_s7 = sshll.u32 %s1509_s1, 4  ;;  %p717_p6 = scmp.lt.s32.totalorder %s1033_s22, 4  ;;  %s157_s7 = int_to_ptr.hbm [resolvable:$true] %s156_s7 }
  0x20   : > { %p702_p2 = pnand %p701_p1, %p1120_p3  ;;  %s36_s11 = sadd.s32 1, %s1029_s21 }
  0x21   : > { %p1163_p7 = pnand %p717_p6, %p1124_p4  ;;  %s33_s15 = sadd.s32 1, %s1025_s20 }
  0x22   : > { %704 = dma.hbm_to_vmem [thread:$0]  (!%p702_p2), %s157_s7, 16, %s159_s9, [#allocation6]  }
  0x23   : > { %s622_s23 = sshll.u32 %s1029_s21, 1  ;;  %p34_p8 = scmp.ge.s32.totalorder %s33_s15, 2 }
  0x24   : > { %s41_s24 = sadd.s32 %s1025_s20, %s622_s23  ;;  %s47_s5 = sadd.s32 1, %s1013_s17 }
  0x25   : > { %s169_s6 = sand.u32 1, %s1013_s17   ;;  %s1531_s15 = smov (%p34_p8, %s33_s15), 0 }
  0x26   : > { %s1533_s11 = smov (!%p34_p8, %s36_s11), %s1029_s21  ;;  %s627_s8 = sshll.u32 %s169_s6, 7 }
  0x27   : > { %p38_p4 = scmp.ge.s32.totalorder %s1533_s11, 2  ;;  %s641_s26 = sshll.u32 %s41_s24, 7 }
  0x28   : > { %s173_s27 = scalar_lea.vmem [#allocation2], %s627_s8  ;;  %s180_s23 = scalar_lea.hbm %s1482_s0, %s641_s26 }
  0x29   : > { %s183_s7 = sshll.u32 %s173_s27, 4  ;;  %s1535_s11 = smov (%p38_p4, %s1533_s11), 0  ;;  %s184_s7 = int_to_ptr.vmem [resolvable:$true] %s183_s7 }
  0x2a   : > { %s623_s20 = sshll.u32 %s1535_s11, 1  ;;  %s91_s30 = ssub.s32 %s1029_s21, %s1535_s11 }
  0x2b   : > { %s43_s12 = sadd.s32 %s623_s20, %s1531_s15  ;;  %p92_p9 = scmp.eq.s32.totalorder %s91_s30, 0 }
  0x2c   : > { %s44_s22 = ssub.s32 %s41_s24, %s43_s12  ;;  %s181_s3 = sshll.u32 %s180_s23, 4  ;;  %s182_s3 = int_to_ptr.hbm [resolvable:$true] %s181_s3 }
  0x2d   : > { %p45_p10 = scmp.eq.s32.totalorder %s44_s22, 0  ;;  %s1511_s8 = sadd.s32 1, %s1001_s14 }
  0x2e   : > { %s1188_s27 = scalar_select %p92_p9, %s1001_s14, %s1511_s8  }
  0x2f   : > { %s1191_s29 = scalar_select %p45_p10, %s1013_s17, %s47_s5  }
  0x30   : > { %s170_s2 = scalar_lea.sflag [#allocation3], %s169_s6  ;;  %s1036_s1 = smov 128  }
  0x31   : > { %s1037_s9 = smov 8   ;;  %195 = sbr.rel (%p1149_p0) target bundleno = 509 (0x1fd), region = 28 }
  0x32   : > { %708 = dma.hbm_to_vmem [thread:$0]  (!%p1163_p7), %s182_s3, 2048, %s184_s7, %s170_s2, %s1036_s1, %s1036_s1, %s1037_s9  }
  0x33   : > { %s197_s20 = sand.u32 (!%p1149_p0), 1, %s1009_s16  }
  0x34   : > { %s632_s12 = sshll.u32 (!%p1149_p0), %s197_s20, 7  ;;  %s198_s30 = scalar_lea.sflag (!%p1149_p0), [#allocation3], %s197_s20 }
  0x35   : > { %s1198_s22 = scalar_lea.vmem (!%p1149_p0), [#allocation2], %s632_s12 }
  0x36   : > { %976 = dma.done.wait (%p1131_p5), %s198_s30, 2048  }
  0x37   : > { %978 = vsyncadd (%p1131_p5), %s198_s30, 4294965248 }
  0x38   : > { %980 = dma.done.wait (%p1120_p3), [#allocation6], 16  }
  0x39   : > { %982 = vsyncadd (%p1120_p3), [#allocation6], 4294967280  ;;  %s1209_s2 = sand.u32 1, %s997_s13   ;;  %p635_p12 = scmp.ne.s32.totalorder %s1017_s18, 0 }
  0x3a   : > { %s634_s3 = sshll.u32 %s1209_s2, 7  ;;  %s1213_s4 = scalar_lea.vmem [#allocation7], %s1209_s2 }
  0x3b   : > { %s1215_s10 = scalar_lea.vmem [#allocation8], %s634_s3  ;;  %240 = sbr.rel (%p635_p12) target bundleno = 82 (0x52), region = 40 }
  0x40   : > { %v1038_v0 = vmov 0.0  }
  0x41   : > { %241 = vst [vmem:[%s1213_s4] sm:$0x1] %v1038_v0 }
  0x42   : > { %242 = vst [vmem:[%s1215_s10] sm:$0xff] %v1038_v0 }
  0x43   : > { %243 = vst [vmem:[%s1215_s10 + $0x8] sm:$0xff] %v1038_v0 }
  0x44   : > { %244 = vst [vmem:[%s1215_s10 + $0x10] sm:$0xff] %v1038_v0 }
  0x45   : > { %245 = vst [vmem:[%s1215_s10 + $0x18] sm:$0xff] %v1038_v0 }
  0x46   : > { %246 = vst [vmem:[%s1215_s10 + $0x20] sm:$0xff] %v1038_v0 }
  0x47   : > { %247 = vst [vmem:[%s1215_s10 + $0x28] sm:$0xff] %v1038_v0 }
  0x48   : > { %248 = vst [vmem:[%s1215_s10 + $0x30] sm:$0xff] %v1038_v0 }
  0x49   : > { %249 = vst [vmem:[%s1215_s10 + $0x38] sm:$0xff] %v1038_v0 }
  0x4a   : > { %250 = vst [vmem:[%s1215_s10 + $0x40] sm:$0xff] %v1038_v0 }
  0x4b   : > { %251 = vst [vmem:[%s1215_s10 + $0x48] sm:$0xff] %v1038_v0 }
  0x4c   : > { %252 = vst [vmem:[%s1215_s10 + $0x50] sm:$0xff] %v1038_v0 }
  0x4d   : > { %253 = vst [vmem:[%s1215_s10 + $0x58] sm:$0xff] %v1038_v0 }
  0x4e   : > { %254 = vst [vmem:[%s1215_s10 + $0x60] sm:$0xff] %v1038_v0 }
  0x4f   : > { %255 = vst [vmem:[%s1215_s10 + $0x68] sm:$0xff] %v1038_v0 }
  0x50   : > { %256 = vst [vmem:[%s1215_s10 + $0x70] sm:$0xff] %v1038_v0 }
  0x51   : > { %257 = vst [vmem:[%s1215_s10 + $0x78] sm:$0xff] %v1038_v0 }
  0x52 PF: > { %v258_v1 = vld [vmem:[%s1198_s22] sm:$0xff]  ;;  %v259_v4 = vld [vmem:[%s1198_s22 + $0x8] sm:$0xff]  ;;  %v260_v6 = vld [vmem:[%s1198_s22 + $0x10] sm:$0xff]  ;;  %s1512_s28 = sld [smem:[#allocation20_spill]]  ;;  %s479_s6 = sshll.u32 %s1213_s4, 4  ;;  %s480_s6 = int_to_ptr.vmem [resolvable:$true] %s479_s6 }
  0x53   : > { %v814_v2 = vld [vmem:[#allocation5] ss:$0 sm:$0xff]  ;;  %v261_v8 = vld [vmem:[%s1198_s22 + $0x18] sm:$0xff]  ;;  %v263_v12 = vld [vmem:[%s1198_s22 + $0x28] sm:$0xff]  ;;  %s464_s7 = scalar_lea.sflag [#allocation4], %s1209_s2 }
  0x54   : > { %v1236_v3 = vsub.f32 %v258_v1, %v814_v2  ;;  %v1240_v5 = vsub.f32 %v259_v4, %v814_v2  ;;  %v1244_v7 = vsub.f32 %v260_v6, %v814_v2  ;;  %v1248_v9 = vsub.f32 %v261_v8, %v814_v2  ;;  %v262_v10 = vld [vmem:[%s1198_s22 + $0x20] sm:$0xff]  ;;  %v264_v14 = vld [vmem:[%s1198_s22 + $0x30] sm:$0xff]  ;;  %v265_v16 = vld [vmem:[%s1198_s22 + $0x38] sm:$0xff] }
  0x55   : > { %v1252_v11 = vsub.f32 %v262_v10, %v814_v2  ;;  %v1256_v13 = vsub.f32 %v263_v12, %v814_v2  ;;  %v1260_v15 = vsub.f32 %v264_v14, %v814_v2  ;;  %v1264_v17 = vsub.f32 %v265_v16, %v814_v2  ;;  %v266_v18 = vld [vmem:[%s1198_s22 + $0x40] sm:$0xff]  ;;  %v267_v20 = vld [vmem:[%s1198_s22 + $0x48] sm:$0xff]  ;;  %v268_v22 = vld [vmem:[%s1198_s22 + $0x50] sm:$0xff] }
  0x56   : > { %334 = vxpose.xlu0.b32.start [1/16] %v1236_v3, 128  ;;  %v1268_v19 = vsub.f32 %v266_v18, %v814_v2  ;;  %v1272_v21 = vsub.f32 %v267_v20, %v814_v2  ;;  %v1276_v23 = vsub.f32 %v268_v22, %v814_v2  ;;  %v272_v24 = vld [vmem:[%s1198_s22 + $0x70] sm:$0xff]  ;;  %v273_v25 = vld [vmem:[%s1198_s22 + $0x78] sm:$0xff]  ;;  %v271_v28 = vld [vmem:[%s1198_s22 + $0x68] sm:$0xff]  ;;  %v295_v8 = vadd.f32 %v1240_v5, %v1236_v3 }
  0x57   : > { %v269_v26 = vld [vmem:[%s1198_s22 + $0x58] sm:$0xff]  ;;  %v1282_v27 = vsub.f32 %v273_v25, %v814_v2  ;;  %v1285_v29 = vsub.f32 %v272_v24, %v814_v2  ;;  %v270_v31 = vld [vmem:[%s1198_s22 + $0x60] sm:$0xff]  ;;  %v1294_v32 = vsub.f32 %v271_v28, %v814_v2  ;;  %v319_v53 = vld [vmem:[%s1215_s10 + $0x8] sm:$0xff] }
  0x58   : > { %v1289_v30 = vsub.f32 %v269_v26, %v814_v2  ;;  %v1300_v33 = vsub.f32 %v270_v31, %v814_v2  ;;  %v318_v50 = vld [vmem:[%s1215_s10] sm:$0xff]  ;;  %v320_v56 = vld [vmem:[%s1215_s10 + $0x10] sm:$0xff]  ;;  %v321_v59 = vld [vmem:[%s1215_s10 + $0x18] sm:$0xff]  ;;  %v296_v14 = vadd.f32 %v295_v8, %v1244_v7  ;;  %s477_s24 = scalar_lea.hbm %s1512_s28, %s1021_s19  ;;  %s895_s20 = scalar_lea.hbm %s1512_s28, 2 }
  0x59   : > { %366 = vmatpush.msra.mxu0 %v1282_v27  ;;  %643 = vmatpush.msra.mxu1 %v1282_v27  ;;  %v322_v62 = vld [vmem:[%s1215_s10 + $0x20] sm:$0xff]  ;;  %v323_v1 = vld [vmem:[%s1215_s10 + $0x28] sm:$0xff]  ;;  %v324_v6 = vld [vmem:[%s1215_s10 + $0x30] sm:$0xff]  ;;  %s481_s26 = sshll.u32 %s477_s24, 4  ;;  %s482_s26 = int_to_ptr.hbm [resolvable:$true] %s481_s26 }
  0x5a   : > { %644 = vmatpush.msra.mxu2 %v1282_v27  ;;  %645 = vmatpush.msra.mxu3 %v1282_v27  ;;  %v325_v16 = vld [vmem:[%s1215_s10 + $0x38] sm:$0xff]  ;;  %v297_v18 = vadd.f32 %v296_v14, %v1248_v9  ;;  %s889_s23 = sshra.s32 %s482_s26, 4  ;;  %s890_s23 = int_to_ptr.hbm [resolvable:$true] %s889_s23 }
  0x5b   : > { %367 = vmatpush.msra.mxu0 %v1285_v29  ;;  %646 = vmatpush.msra.mxu1 %v1285_v29  ;;  %s891_s8 = scalar_lea.hbm %s890_s23, 1  ;;  %p896_p1 = scmp.lt.s32.totalorder %s890_s23, %s1512_s28 }
  0x5c   : > { %647 = vmatpush.msra.mxu2 %v1285_v29  ;;  %648 = vmatpush.msra.mxu3 %v1285_v29  ;;  %v298_v24 = vadd.f32 %v297_v18, %v1252_v11  ;;  %p892_p3 = scmp.ne.s32.totalorder %s890_s23, %s891_s8  ;;  %p897_p2 = scmp.lt.s32.totalorder %s895_s20, %s891_s8 }
  0x5d   : > { %368 = vmatpush.msra.mxu0 %v1294_v32  ;;  %649 = vmatpush.msra.mxu1 %v1294_v32 }
  0x5e   : > { %335 = vxpose.xlu0.b32.cont [2/16] %v1240_v5, 128  ;;  %650 = vmatpush.msra.mxu2 %v1294_v32  ;;  %v299_v25 = vadd.f32 %v298_v24, %v1256_v13  ;;  %p893_p5 = pnand %p892_p3, %p1140_p11  ;;  %p898_p6 = por %p897_p2, %p896_p1 }
  0x5f   : > { %369 = vmatpush.msra.mxu0 %v1300_v33  ;;  %652 = vmatpush.msra.mxu1 %v1300_v33 }
  0x60   : > { %653 = vmatpush.msra.mxu2 %v1300_v33  ;;  %651 = vmatpush.msra.mxu3 %v1294_v32  ;;  %v300_v26 = vadd.f32 %v299_v25, %v1260_v15  ;;  %p894_p0 = pneg %p893_p5 }
  0x61   : > { %370 = vmatpush.msra.mxu0 %v1289_v30  ;;  %655 = vmatpush.msra.mxu1 %v1289_v30 }
  0x62   : > { %656 = vmatpush.msra.mxu2 %v1289_v30  ;;  %654 = vmatpush.msra.mxu3 %v1300_v33  ;;  %p899_p7 = pnand %p898_p6, %p894_p0 }
  0x63   : > { %371 = vmatpush.msra.mxu0 %v1276_v23  ;;  %658 = vmatpush.msra.mxu1 %v1276_v23 }
  0x64   : > { %659 = vmatpush.msra.mxu2 %v1276_v23  ;;  %657 = vmatpush.msra.mxu3 %v1289_v30 }
  0x65   : > { %372 = vmatpush.msra.mxu0 %v1272_v21  ;;  %661 = vmatpush.msra.mxu1 %v1272_v21 }
  0x66   : > { %336 = vxpose.xlu0.b32.cont [3/16] %v1244_v7, 128  ;;  %662 = vmatpush.msra.mxu2 %v1272_v21 }
  0x67   : > { %373 = vmatpush.msra.mxu0 %v1268_v19  ;;  %664 = vmatpush.msra.mxu1 %v1268_v19 }
  0x68   : > { %665 = vmatpush.msra.mxu2 %v1268_v19  ;;  %660 = vmatpush.msra.mxu3 %v1276_v23 }
  0x69   : > { %374 = vmatpush.msra.mxu0 %v1264_v17  ;;  %667 = vmatpush.msra.mxu1 %v1264_v17 }
  0x6a   : > { %668 = vmatpush.msra.mxu2 %v1264_v17  ;;  %663 = vmatpush.msra.mxu3 %v1272_v21 }
  0x6b   : > { %375 = vmatpush.msra.mxu0 %v1260_v15  ;;  %670 = vmatpush.msra.mxu1 %v1260_v15 }
  0x6c   : > { %671 = vmatpush.msra.mxu2 %v1260_v15  ;;  %666 = vmatpush.msra.mxu3 %v1268_v19 }
  0x6d   : > { %376 = vmatpush.msra.mxu0 %v1256_v13  ;;  %673 = vmatpush.msra.mxu1 %v1256_v13 }
  0x6e   : > { %337 = vxpose.xlu0.b32.cont [4/16] %v1248_v9, 128  ;;  %674 = vmatpush.msra.mxu2 %v1256_v13 }
  0x6f   : > { %377 = vmatpush.msra.mxu0 %v1252_v11  ;;  %676 = vmatpush.msra.mxu1 %v1252_v11 }
  0x70   : > { %677 = vmatpush.msra.mxu2 %v1252_v11  ;;  %669 = vmatpush.msra.mxu3 %v1264_v17 }
  0x71   : > { %378 = vmatpush.msra.mxu0 %v1248_v9  ;;  %679 = vmatpush.msra.mxu1 %v1248_v9 }
  0x72   : > { %680 = vmatpush.msra.mxu2 %v1248_v9  ;;  %672 = vmatpush.msra.mxu3 %v1260_v15 }
  0x73   : > { %379 = vmatpush.msra.mxu0 %v1244_v7  ;;  %682 = vmatpush.msra.mxu1 %v1244_v7 }
  0x74   : > { %683 = vmatpush.msra.mxu2 %v1244_v7  ;;  %675 = vmatpush.msra.mxu3 %v1256_v13 }
  0x75   : > { %380 = vmatpush.msra.mxu0 %v1240_v5  ;;  %685 = vmatpush.msra.mxu1 %v1240_v5 }
  0x76   : > { %338 = vxpose.xlu0.b32.cont [5/16] %v1252_v11, 128  ;;  %686 = vmatpush.msra.mxu2 %v1240_v5 }
  0x77   : > { %381 = vmatpush.msra.mxu0 %v1236_v3  ;;  %688 = vmatpush.msra.mxu1 %v1236_v3 }
  0x78   : > { %689 = vmatpush.msra.mxu2 %v1236_v3  ;;  %678 = vmatpush.msra.mxu3 %v1252_v11 }
  0x7a   : > { %681 = vmatpush.msra.mxu3 %v1248_v9 }
  0x7c   : > { %684 = vmatpush.msra.mxu3 %v1244_v7  ;;  %v326_v7 = vld [vmem:[%s1215_s10 + $0x40] sm:$0xff] }
  0x7e   : > { %339 = vxpose.xlu0.b32.cont [6/16] %v1256_v13, 128  ;;  %687 = vmatpush.msra.mxu3 %v1240_v5 }
  0x80   : > { %690 = vmatpush.msra.mxu3 %v1236_v3  ;;  %v301_v3 = vadd.f32 %v300_v26, %v1264_v17 }
  0x82   : > { %v302_v5 = vadd.f32 %v301_v3, %v1268_v19 }
  0x84   : > { %v303_v28 = vadd.f32 %v302_v5, %v1272_v21 }
  0x86   : > { %340 = vxpose.xlu0.b32.cont [7/16] %v1260_v15, 128  ;;  %v327_v15 = vld [vmem:[%s1215_s10 + $0x48] sm:$0xff] }
  0x8e   : > { %341 = vxpose.xlu0.b32.cont [8/16] %v1264_v17, 128 }
  0x96   : > { %342 = vxpose.xlu0.b32.cont [9/16] %v1268_v19, 128 }
  0x9e   : > { %343 = vxpose.xlu0.b32.cont [10/16] %v1272_v21, 128 }
  0xa6   : > { %344 = vxpose.xlu0.b32.cont [11/16] %v1276_v23, 128 }
  0xae   : > { %345 = vxpose.xlu0.b32.cont [12/16] %v1289_v30, 128 }
  0xb6   : > { %346 = vxpose.xlu0.b32.cont [13/16] %v1300_v33, 128 }
  0xbe   : > { %347 = vxpose.xlu0.b32.cont [14/16] %v1294_v32, 128 }
  0xc6   : > { %348 = vxpose.xlu0.b32.cont [15/16] %v1285_v29, 128 }
  0xce   : > { %349 = vxpose.xlu0.b32.end [16/16] %v1282_v27, 128 }
  0xfa   : > { %v350_v34 = vpop.trf.xlu0 }
  0xfb   : > { %382 = vmatmul.f32.vlgmr.msra.gmra.mxu0 %v350_v34  ;;  %v304_v34 = vadd.f32 %v303_v28, %v1276_v23 }
  0xfd   : > { %v305_v11 = vadd.f32 %v304_v34, %v1289_v30 }
  0xff   : > { %v306_v13 = vadd.f32 %v305_v11, %v1300_v33 }
 0x101   : > { %v307_v17 = vadd.f32 %v306_v13, %v1294_v32 }
 0x102   : > { %v351_v35 = vpop.trf.xlu0 }
 0x103   : > { %385 = vmatmul.f32.gmra.mxu0 %v351_v35  ;;  %v308_v21 = vadd.f32 %v307_v17, %v1285_v29 }
 0x10a   : > { %v352_v36 = vpop.trf.xlu0 }
 0x10b   : > { %388 = vmatmul.f32.gmra.mxu0 %v352_v36  ;;  %v309_v36 = vadd.f32 %v308_v21, %v1282_v27 }
 0x10d   : > { %v310_v23 = vrot.slane %v309_v36, 4 }
 0x112   : > { %v353_v37 = vpop.trf.xlu0 }
 0x113   : > { %391 = vmatmul.f32.gmra.mxu0 %v353_v37  ;;  %v328_v37 = vld [vmem:[%s1215_s10 + $0x50] sm:$0xff] }
 0x11a   : > { %v354_v38 = vpop.trf.xlu0 }
 0x11b   : > { %394 = vmatmul.f32.vlgmr.msra.gmra.mxu1 %v354_v38  ;;  %v311_v38 = vadd.f32 %v310_v23, %v309_v36 }
 0x11d   : > { %v312_v33 = vrot.slane %v311_v38, 2 }
 0x11f   : > { %v313_v32 = vadd.f32 %v312_v33, %v311_v38 }
 0x121   : > { %v314_v29 = vrot.slane %v313_v32, 1 }
 0x122   : > { %v355_v39 = vpop.trf.xlu0 }
 0x123   : > { %397 = vmatmul.f32.gmra.mxu1 %v355_v39 }
 0x12a   : > { %v356_v40 = vpop.trf.xlu0 }
 0x12b   : > { %400 = vmatmul.f32.gmra.mxu1 %v356_v40  ;;  %v329_v40 = vld [vmem:[%s1215_s10 + $0x58] sm:$0xff] }
 0x132   : > { %v357_v41 = vpop.trf.xlu0 }
 0x133   : > { %403 = vmatmul.f32.gmra.mxu1 %v357_v41  ;;  %v315_v41 = vadd.f32 %v314_v29, %v313_v32 }
 0x13a   : > { %v358_v42 = vpop.trf.xlu0 }
 0x13b   : > { %406 = vmatmul.f32.vlgmr.msra.gmra.mxu2 %v358_v42  ;;  %v294_v42 = vld [vmem:[%s1213_s4] sm:$0x1] }
 0x142   : > { %v359_v43 = vpop.trf.xlu0 }
 0x143   : > { %409 = vmatmul.f32.gmra.mxu2 %v359_v43 }
 0x14a   : > { %v360_v44 = vpop.trf.xlu0 }
 0x14b   : > { %412 = vmatmul.f32.gmra.mxu2 %v360_v44  ;;  %v316_v44 = vadd.f32 %v315_v41, %v294_v42 }
 0x14d   : > { %317 = vst [vmem:[%s1213_s4] sm:$0x1] %v316_v44 }
 0x152   : > { %v361_v45 = vpop.trf.xlu0 }
 0x153   : > { %415 = vmatmul.f32.gmra.mxu2 %v361_v45 }
 0x15a   : > { %v362_v46 = vpop.trf.xlu0 }
 0x15b   : > { %418 = vmatmul.f32.vlgmr.msra.gmra.mxu3 %v362_v46 }
 0x162   : > { %v363_v47 = vpop.trf.xlu0 }
 0x163   : > { %421 = vmatmul.f32.gmra.mxu3 %v363_v47 }
 0x16a   : > { %v364_v48 = vpop.trf.xlu0 }
 0x16b   : > { %424 = vmatmul.f32.gmra.mxu3 %v364_v48 }
 0x172   : > { %v365_v49 = vpop.trf.xlu0 }
 0x173   : > { %427 = vmatmul.f32.gmra.mxu3 %v365_v49 }
 0x178   : > { %v383_v51 = vpop.f32.mrf.mxu0 }
 0x179   : > { %v431_v52 = vadd.f32 %v383_v51, %v318_v50 }
 0x17b   : > { %447 = vst [vmem:[%s1215_s10] sm:$0xff] %v431_v52 }
 0x180   : > { %v386_v54 = vpop.f32.mrf.mxu0 }
 0x181   : > { %v432_v55 = vadd.f32 %v386_v54, %v319_v53 }
 0x183   : > { %448 = vst [vmem:[%s1215_s10 + $0x8] sm:$0xff] %v432_v55 }
 0x188   : > { %v389_v57 = vpop.f32.mrf.mxu0 }
 0x189   : > { %v433_v58 = vadd.f32 %v389_v57, %v320_v56 }
 0x18b   : > { %449 = vst [vmem:[%s1215_s10 + $0x10] sm:$0xff] %v433_v58 }
 0x190   : > { %v392_v60 = vpop.f32.mrf.mxu0 }
 0x191   : > { %v434_v61 = vadd.f32 %v392_v60, %v321_v59 }
 0x193   : > { %450 = vst [vmem:[%s1215_s10 + $0x18] sm:$0xff] %v434_v61 }
 0x198   : > { %v395_v63 = vpop.f32.mrf.mxu1 }
 0x199   : > { %v435_v0 = vadd.f32 %v395_v63, %v322_v62 }
 0x19b   : > { %451 = vst [vmem:[%s1215_s10 + $0x20] sm:$0xff] %v435_v0 }
 0x1a0   : > { %v398_v2 = vpop.f32.mrf.mxu1 }
 0x1a1   : > { %v436_v4 = vadd.f32 %v398_v2, %v323_v1 }
 0x1a3   : > { %452 = vst [vmem:[%s1215_s10 + $0x28] sm:$0xff] %v436_v4 }
 0x1a8   : > { %v401_v10 = vpop.f32.mrf.mxu1 }
 0x1a9   : > { %v437_v12 = vadd.f32 %v401_v10, %v324_v6 }
 0x1ab   : > { %453 = vst [vmem:[%s1215_s10 + $0x30] sm:$0xff] %v437_v12 }
 0x1b0   : > { %v404_v20 = vpop.f32.mrf.mxu1 }
 0x1b1   : > { %v438_v22 = vadd.f32 %v404_v20, %v325_v16 }
 0x1b3   : > { %454 = vst [vmem:[%s1215_s10 + $0x38] sm:$0xff] %v438_v22 }
 0x1be   : > { %v407_v9 = vpop.f32.mrf.mxu2 }
 0x1bf   : > { %v439_v31 = vadd.f32 %v407_v9, %v326_v7 }
 0x1c1   : > { %455 = vst [vmem:[%s1215_s10 + $0x40] sm:$0xff] %v439_v31 }
 0x1c6   : > { %v410_v19 = vpop.f32.mrf.mxu2 }
 0x1c7   : > { %v440_v35 = vadd.f32 %v410_v19, %v327_v15 }
 0x1c9   : > { %456 = vst [vmem:[%s1215_s10 + $0x48] sm:$0xff] %v440_v35 }
 0x1ce   : > { %v413_v30 = vpop.f32.mrf.mxu2 }
 0x1cf   : > { %v441_v39 = vadd.f32 %v413_v30, %v328_v37 }
 0x1d1   : > { %457 = vst [vmem:[%s1215_s10 + $0x50] sm:$0xff] %v441_v39 }
 0x1d6   : > { %v416_v27 = vpop.f32.mrf.mxu2 }
 0x1d7   : > { %v442_v43 = vadd.f32 %v416_v27, %v329_v40 }
 0x1d9   : > { %458 = vst [vmem:[%s1215_s10 + $0x58] sm:$0xff] %v442_v43 }
 0x1da   : > { %902 = shalt.err (!%p899_p7)
}
 0x1db   : > { %697 = dma.vmem_to_hbm [thread:$0]  (%p1140_p11), %s480_s6, 16, %s482_s26, %s464_s7   ;;  %v330_v45 = vld [vmem:[%s1215_s10 + $0x60] sm:$0xff]  ;;  %v331_v48 = vld [vmem:[%s1215_s10 + $0x68] sm:$0xff]  ;;  %v332_v51 = vld [vmem:[%s1215_s10 + $0x70] sm:$0xff] }
 0x1dc   : > { %s642_s22 = sshll.u32 %s1021_s19, 7  ;;  %s1514_s18 = sld [smem:[#allocation21_spill]]  ;;  %v333_v54 = vld [vmem:[%s1215_s10 + $0x78] sm:$0xff] }
 0x1dd   : > { %s493_s6 = sshll.u32 %s1215_s10, 4  ;;  %s468_s7 = scalar_lea.sflag [#allocation9], %s1209_s2  ;;  %s494_s6 = int_to_ptr.vmem [resolvable:$true] %s493_s6 }
 0x1de   : > { %v419_v46 = vpop.f32.mrf.mxu3 }
 0x1df   : > { %v443_v47 = vadd.f32 %v419_v46, %v330_v45 }
 0x1e1   : > { %459 = vst [vmem:[%s1215_s10 + $0x60] sm:$0xff] %v443_v47 }
 0x1e2   : > { %s1515_s25 = smov %s1514_s18  ;;  %s492_s24 = scalar_lea.hbm %s1514_s18, %s642_s22 }
 0x1e3   : > { %s495_s26 = sshll.u32 %s492_s24, 4  ;;  %s923_s9 = scalar_lea.hbm %s1515_s25, 256  ;;  %s496_s26 = int_to_ptr.hbm [resolvable:$true] %s495_s26 }
 0x1e4   : > { %s917_s23 = sshra.s32 %s496_s26, 4  ;;  %s918_s23 = int_to_ptr.hbm [resolvable:$true] %s917_s23 }
 0x1e5   : > { %s919_s19 = scalar_lea.hbm %s918_s23, 128  ;;  %p924_p10 = scmp.lt.s32.totalorder %s918_s23, %s1515_s25 }
 0x1e6   : > { %v422_v49 = vpop.f32.mrf.mxu3  ;;  %p920_p8 = scmp.ne.s32.totalorder %s918_s23, %s919_s19  ;;  %p925_p12 = scmp.lt.s32.totalorder %s923_s9, %s919_s19 }
 0x1e7   : > { %v444_v50 = vadd.f32 %v422_v49, %v331_v48 }
 0x1e8   : > { %p921_p4 = pnand %p920_p8, %p1140_p11  ;;  %p926_p3 = por %p925_p12, %p924_p10 }
 0x1e9   : > { %460 = vst [vmem:[%s1215_s10 + $0x68] sm:$0xff] %v444_v50 }
 0x1ea   : > { %p922_p9 = pneg %p921_p4 }
 0x1ec   : > { %p927_p5 = pnand %p926_p3, %p922_p9 }
 0x1ee   : > { %v425_v52 = vpop.f32.mrf.mxu3 }
 0x1ef   : > { %v445_v53 = vadd.f32 %v425_v52, %v332_v51 }
 0x1f1   : > { %461 = vst [vmem:[%s1215_s10 + $0x70] sm:$0xff] %v445_v53 }
 0x1f6   : > { %v428_v55 = vpop.f32.mrf.mxu3 }
 0x1f7   : > { %v446_v56 = vadd.f32 %v428_v55, %v333_v54 }
 0x1f9   : > { %462 = vst [vmem:[%s1215_s10 + $0x78] sm:$0xff] %v446_v56 }
 0x1fa   : > { %930 = shalt.err (!%p927_p5)
}
 0x1fb   : > { %s1039_s2 = smov 128   ;;  %s1040_s10 = smov 8  }
 0x1fc   : > { %698 = dma.vmem_to_hbm [thread:$0]  (%p1140_p11), %s494_s6, 2048, %s496_s26, %s468_s7, %s1039_s2, %s1039_s2, %s1040_s10  }
 0x1fd PF: > { %s1516_s30 = sld [smem:[#allocation16_spill]] }
 0x1fe   : > { %s1517_s22 = sld [smem:[#allocation14_spill]] }
 0x203   : > { %p719_p0 = scmp.ge.s32.totalorder %s1516_s30, 2 }
 0x204   : > { %s510_s4 = sand.u32 1, %s1517_s22  }
 0x205   : > { %p710_p1 = pnand %p719_p0, %p1145_p13  ;;  %s511_s18 = scalar_lea.sflag [#allocation4], %s510_s4 }
 0x207   : > { %p711_p2 = pneg %p710_p1 }
 0x209   : > { %984 = dma.done.wait (%p711_p2), %s511_s18, 16  }
 0x20a   : > { %986 = vsyncadd (%p711_p2), %s511_s18, 4294967280  ;;  %s520_s24 = scalar_lea.sflag [#allocation9], %s510_s4 }
 0x20b   : > { %988 = dma.done.wait (%p711_p2), %s520_s24, 2048  }
 0x20c   : > { %990 = vsyncadd (%p711_p2), %s520_s24, 4294965248  ;;  %s24_s22 = sadd.s32 1, %s1516_s30   ;;  %s1519_s18 = sld [smem:[#allocation15_spill]] }
 0x20d   : > { %p21_p6 = scmp.ge.s32.totalorder %s24_s22, 6   ;;  %s1520_s5 = smov %s1531_s15 }
 0x20e   : > { %s1521_s12 = smov %s997_s13  ;;  %s1522_s13 = smov %s1001_s14 }
 0x20f   : > { %s1523_s14 = smov %s1188_s27  ;;  %s1524_s15 = smov %s1009_s16 }
 0x210   : > { %s1525_s16 = smov %s1013_s17  ;;  %s1526_s17 = smov %s1191_s29 }
 0x211   : > { %s1527_s19 = smov %s1029_s21  ;;  %s1528_s20 = smov %s1520_s5 }
 0x212   : > { %s1529_s21 = smov %s1535_s11  ;;  %23 = sbr.rel (!%p21_p6) target bundleno = 16 (0x10), region = 98 }
 0x217   :  { %526 = vsyncpa [#allocation3], 1 }
 0x218   :  { %528 = vsyncpa [#allocation3 + $0x1], 1 }
 0x219   :  { %529 = vsyncpa [#allocation6], 1 }
 0x21a   :  { %530 = vsyncpa [#allocation4], 1 }
 0x21b   :  { %532 = vsyncpa [#allocation4 + $0x1], 1 }
 0x21c   :  { %533 = vsyncpa [#allocation9], 1 }
 0x21d   :  { %535 = vsyncpa [#allocation9 + $0x1], 1 }

</bundles_post_ra>
